<compile_context>
chip_gen: v7x
topology: tpu7x:2x2x1
jax: 0.10.0
libtpu: 0.0.40
codegen_flags: <defaults>
</compile_context>

<pallas_src>
import jax
import jax.numpy as jnp
from jax.experimental import pallas as pl
from jax.experimental.pallas import tpu as pltpu


def _make_rnn_kernel(seq_len: int, b_pad: int, h_dim: int, o_pad: int):
    """Builds a single-invocation RNN kernel for static shapes."""

    def rnn_kernel(x_ref, h0_ref, wx_ref, wh_ref, b1_ref, wo_ref, b2_ref,
                   y_ref):
        # Load weights once; hoist bias broadcasts out of the loop
        # (JAX does not CSE broadcast_in_dim).
        wx = wx_ref[...]                                        # (I_pad, H)
        wh = wh_ref[...]                                        # (H, H)
        wo = wo_ref[...]                                        # (H, O_pad)
        b1b = jnp.broadcast_to(b1_ref[...], (b_pad, h_dim))     # (B_pad, H)
        b2b = jnp.broadcast_to(b2_ref[...], (b_pad, o_pad))     # (B_pad, O_pad)

        h = h0_ref[...]                                         # (B_pad, H)

        # Fully unrolled serial recurrence. Only (h @ Wh -> tanh) sits on the
        # dependence chain; the per-step input projection and the per-step
        # output projection + store are independent of the chain and get
        # scheduled under it by the LLO scheduler.
        for i in range(seq_len):
            xp = jnp.dot(x_ref[i], wx,
                         preferred_element_type=jnp.float32) + b1b
            h = jnp.tanh(xp + jnp.dot(h, wh,
                                      preferred_element_type=jnp.float32))
            out = jnp.dot(h, wo, preferred_element_type=jnp.float32) + b2b
            # Lane-dense (B_pad, O_pad)=(24,128) store, 8-row aligned.
            y_ref[i] = jnp.maximum(out, 0.0)

    return rnn_kernel


def recurrent_layer_forward(x, hidden, w_i2h, b_i2h, w_i2o, b_i2o):
    """x: (input_size, seq, batch); hidden: (hidden_size, batch) (PyTorch layout)."""
    I, S, B = x.shape
    H = hidden.shape[0]
    O = w_i2o.shape[0]

    B_pad = pl.cdiv(B, 8) * 8            # sublane-align batch   (20 -> 24)
    I_pad = pl.cdiv(I, 8) * 8            # align contraction dim (57 -> 64)
    O_pad = pl.cdiv(O, 128) * 128        # lane-dense output     (67 -> 128)

    # (I, S, B) -> (S, B, I) -> pad batch & contraction dim -> (S, B_pad, I_pad)
    # TODO(synk): if this wrapper relayout dominates the xprof trace, change the
    # caller-side layout to (S, B, I) in / (S, B, O) out instead.
    x_k = jnp.transpose(x, (1, 2, 0)).astype(jnp.float32)
    x_k = jnp.pad(x_k, ((0, 0), (0, B_pad - B), (0, I_pad - I)))

    h0_k = jnp.pad(hidden.T.astype(jnp.float32),
                   ((0, B_pad - B), (0, 0)))                      # (B_pad, H)

    wx = jnp.pad(w_i2h[:, :I].T.astype(jnp.float32),
                 ((0, I_pad - I), (0, 0)))                        # (I_pad, H)
    wh = w_i2h[:, I:].T.astype(jnp.float32)                       # (H, H)
    b1 = b_i2h.astype(jnp.float32).reshape(1, H)
    wo = jnp.pad(w_i2o.T.astype(jnp.float32),
                 ((0, 0), (0, O_pad - O)))                        # (H, O_pad)
    b2 = jnp.pad(b_i2o.astype(jnp.float32),
                 (0, O_pad - O)).reshape(1, O_pad)

    flops = 2 * S * B_pad * (I_pad * H + H * H + H * O_pad)
    bytes_accessed = 4 * (x_k.size + h0_k.size + wx.size + wh.size
                          + b1.size + wo.size + b2.size + S * B_pad * O_pad)
    cost = pl.CostEstimate(flops=flops,
                           transcendentals=S * B_pad * H,
                           bytes_accessed=bytes_accessed)

    y_k = pl.pallas_call(
        _make_rnn_kernel(S, B_pad, H, O_pad),
        out_shape=jax.ShapeDtypeStruct((S, B_pad, O_pad), jnp.float32),
        grid_spec=pltpu.PrefetchScalarGridSpec(
            num_scalar_prefetch=0,
            grid=(1,),                                  # single invocation
            in_specs=[
                pl.BlockSpec((S, B_pad, I_pad), lambda i: (0, 0, 0)),  # x (all steps)
                pl.BlockSpec((B_pad, H), lambda i: (0, 0)),            # h0
                pl.BlockSpec((I_pad, H), lambda i: (0, 0)),            # Wx (padded)
                pl.BlockSpec((H, H), lambda i: (0, 0)),                # Wh
                pl.BlockSpec((1, H), lambda i: (0, 0)),                # b1
                pl.BlockSpec((H, O_pad), lambda i: (0, 0)),            # Wo (padded)
                pl.BlockSpec((1, O_pad), lambda i: (0, 0)),            # b2 (padded)
            ],
            out_specs=pl.BlockSpec((S, B_pad, O_pad), lambda i: (0, 0, 0)),
        ),
        compiler_params=pltpu.CompilerParams(
            dimension_semantics=("arbitrary",)),        # serial recurrence
        cost_estimate=cost,
    )(x_k, h0_k, wx, wh, b1, wo, b2)

    # Strip padding and restore the PyTorch layout (O, S, B).
    y = y_k[:, :B, :O]
    return jnp.transpose(y, (2, 0, 1))


def reference_forward(x, hidden, w_i2h, b_i2h, w_i2o, b_i2o):
    """Pure-JAX reference mirroring the PyTorch loop (for verification)."""
    I, S, B = x.shape
    h = hidden  # (H, B)
    ys = []
    for i in range(S):
        combined = jnp.concatenate([x[:, i, :], h], axis=0).T     # (B, I+H)
        h = jnp.tanh(combined @ w_i2h.T + b_i2h)                  # (B, H)
        out = jnp.maximum(h @ w_i2o.T + b_i2o, 0.0)               # (B, O)
        h = h.T                                                   # (H, B)
        ys.append(out.T)                                          # (O, B)
    return jnp.stack(ys, axis=1)                                  # (O, S, B)


if __name__ == "__main__":
    # Shapes implied by the PyTorch module / script.
    INPUT_SIZE = 57     # n_words
    SEQ_LEN = 6
    BATCH = 20
    HIDDEN = 32
    OUTPUT = 67         # fixed in the module

    key = jax.random.PRNGKey(0)
    kx, kw1, kb1, kw2, kb2, kdrop = jax.random.split(key, 6)

    x = jax.random.uniform(kx, (INPUT_SIZE, SEQ_LEN, BATCH), dtype=jnp.float32)

    # Deterministic parameter init (nn.Linear-like uniform bounds).
    bound1 = 1.0 / jnp.sqrt(INPUT_SIZE + HIDDEN)
    w_i2h = jax.random.uniform(kw1, (HIDDEN, INPUT_SIZE + HIDDEN),
                               minval=-bound1, maxval=bound1, dtype=jnp.float32)
    b_i2h = jax.random.uniform(kb1, (HIDDEN,),
                               minval=-bound1, maxval=bound1, dtype=jnp.float32)
    bound2 = 1.0 / jnp.sqrt(HIDDEN)
    w_i2o = jax.random.uniform(kw2, (OUTPUT, HIDDEN),
                               minval=-bound2, maxval=bound2, dtype=jnp.float32)
    b_i2o = jax.random.uniform(kb2, (OUTPUT,),
                               minval=-bound2, maxval=bound2, dtype=jnp.float32)

    # self.hidden = zeros(hidden_size, BATCH), then per-column Bernoulli(0.5)
    # mask (a no-op on zeros, kept for semantic fidelity; note PyTorch's own
    # code omits the 1/(1-p) dropout scaling too).
    hidden = jnp.zeros((HIDDEN, BATCH), dtype=jnp.float32)
    drop = jax.random.bernoulli(kdrop, 0.5, (HIDDEN, BATCH)).astype(jnp.float32)
    hidden = hidden * drop

    y = recurrent_layer_forward(x, hidden, w_i2h, b_i2h, w_i2o, b_i2o)
    y = jax.block_until_ready(y)

    y_ref = reference_forward(x, hidden, w_i2h, b_i2h, w_i2o, b_i2o)
    assert y.shape == (OUTPUT, SEQ_LEN, BATCH)
    assert jnp.allclose(y, y_ref, atol=1e-5, rtol=1e-5)

    print("KERNEL_OK")
</pallas_src>

<mosaic_0001>
module attributes {stable_mosaic.version = 11 : i64} {
  func.func @rnn_kernel(%arg0: i32, %arg1: memref<6x24x64xf32, #tpu.memory_space<vmem>>, %arg2: memref<24x32xf32, #tpu.memory_space<vmem>>, %arg3: memref<64x32xf32, #tpu.memory_space<vmem>>, %arg4: memref<32x32xf32, #tpu.memory_space<vmem>>, %arg5: memref<1x32xf32, #tpu.memory_space<vmem>>, %arg6: memref<32x128xf32, #tpu.memory_space<vmem>>, %arg7: memref<1x128xf32, #tpu.memory_space<vmem>>, %arg8: memref<6x24x128xf32, #tpu.memory_space<vmem>>) attributes {dimension_semantics = [#tpu.dimension_semantics<arbitrary>], iteration_bounds = array<i64: 1>, scalar_prefetch = 0 : i64, scratch_operands = 0 : i64, tpu.core_type = #tpu.core_type<tc>, window_params = [{pipeline_mode = #tpu.pipeline_mode<synchronous>, transform_indices = @transform_0, window_bounds = array<i64: 6, 24, 64>}, {pipeline_mode = #tpu.pipeline_mode<synchronous>, transform_indices = @transform_1, window_bounds = array<i64: 24, 32>}, {pipeline_mode = #tpu.pipeline_mode<synchronous>, transform_indices = @transform_2, window_bounds = array<i64: 64, 32>}, {pipeline_mode = #tpu.pipeline_mode<synchronous>, transform_indices = @transform_3, window_bounds = array<i64: 32, 32>}, {pipeline_mode = #tpu.pipeline_mode<synchronous>, transform_indices = @transform_4, window_bounds = array<i64: 1, 32>}, {pipeline_mode = #tpu.pipeline_mode<synchronous>, transform_indices = @transform_5, window_bounds = array<i64: 32, 128>}, {pipeline_mode = #tpu.pipeline_mode<synchronous>, transform_indices = @transform_6, window_bounds = array<i64: 1, 128>}, {pipeline_mode = #tpu.pipeline_mode<synchronous>, transform_indices = @transform_7, window_bounds = array<i64: 6, 24, 128>}]} {
    %c0 = arith.constant 0 : index
    %c0_0 = arith.constant 0 : index
    %0 = vector.load %arg3[%c0, %c0_0] : memref<64x32xf32, #tpu.memory_space<vmem>>, vector<64x32xf32>
    %c0_1 = arith.constant 0 : index
    %c0_2 = arith.constant 0 : index
    %1 = vector.load %arg4[%c0_1, %c0_2] : memref<32x32xf32, #tpu.memory_space<vmem>>, vector<32x32xf32>
    %c0_3 = arith.constant 0 : index
    %c0_4 = arith.constant 0 : index
    %2 = vector.load %arg6[%c0_3, %c0_4] : memref<32x128xf32, #tpu.memory_space<vmem>>, vector<32x128xf32>
    %c0_5 = arith.constant 0 : index
    %c0_6 = arith.constant 0 : index
    %3 = vector.load %arg5[%c0_5, %c0_6] : memref<1x32xf32, #tpu.memory_space<vmem>>, vector<1x32xf32>
    %4 = vector.shape_cast %3 : vector<1x32xf32> to vector<1x32xf32>
    %5 = vector.broadcast %4 : vector<1x32xf32> to vector<24x32xf32>
    %c0_7 = arith.constant 0 : index
    %c0_8 = arith.constant 0 : index
    %6 = vector.load %arg7[%c0_7, %c0_8] : memref<1x128xf32, #tpu.memory_space<vmem>>, vector<1x128xf32>
    %7 = vector.shape_cast %6 : vector<1x128xf32> to vector<1x128xf32>
    %8 = vector.broadcast %7 : vector<1x128xf32> to vector<24x128xf32>
    %c0_9 = arith.constant 0 : index
    %c0_10 = arith.constant 0 : index
    %9 = vector.load %arg2[%c0_9, %c0_10] : memref<24x32xf32, #tpu.memory_space<vmem>>, vector<24x32xf32>
    %c0_11 = arith.constant 0 : index
    %c0_12 = arith.constant 0 : index
    %c0_13 = arith.constant 0 : index
    %10 = vector.load %arg1[%c0_11, %c0_12, %c0_13] : memref<6x24x64xf32, #tpu.memory_space<vmem>>, vector<1x24x64xf32>
    %11 = vector.shape_cast %10 : vector<1x24x64xf32> to vector<24x64xf32>
    %cst = arith.constant dense<0.000000e+00> : vector<24x32xf32>
    %12 = tpu.matmul %11, %0, %cst {dimension_numbers = #tpu.dot_dimension_numbers<[1], [0], [0], [1], [0, 0, 1, 1], [], []>} : vector<24x64xf32>, vector<64x32xf32>, vector<24x32xf32> -> vector<24x32xf32>
    %13 = arith.addf %12, %5 : vector<24x32xf32>
    %cst_14 = arith.constant dense<0.000000e+00> : vector<24x32xf32>
    %14 = tpu.matmul %9, %1, %cst_14 {dimension_numbers = #tpu.dot_dimension_numbers<[1], [0], [0], [1], [0, 0, 1, 1], [], []>} : vector<24x32xf32>, vector<32x32xf32>, vector<24x32xf32> -> vector<24x32xf32>
    %15 = arith.addf %13, %14 : vector<24x32xf32>
    %16 = math.tanh %15 : vector<24x32xf32>
    %cst_15 = arith.constant dense<0.000000e+00> : vector<24x128xf32>
    %17 = tpu.matmul %16, %2, %cst_15 {dimension_numbers = #tpu.dot_dimension_numbers<[1], [0], [0], [1], [0, 0, 1, 1], [], []>} : vector<24x32xf32>, vector<32x128xf32>, vector<24x128xf32> -> vector<24x128xf32>
    %18 = arith.addf %17, %8 : vector<24x128xf32>
    %cst_16 = arith.constant 0.000000e+00 : f32
    %19 = vector.broadcast %cst_16 : f32 to vector<24x128xf32>
    %20 = arith.maximumf %18, %19 : vector<24x128xf32>
    %c0_17 = arith.constant 0 : index
    %c0_18 = arith.constant 0 : index
    %c0_19 = arith.constant 0 : index
    %21 = vector.load %arg8[%c0_17, %c0_18, %c0_19] : memref<6x24x128xf32, #tpu.memory_space<vmem>>, vector<1x24x128xf32>
    %22 = vector.shape_cast %21 : vector<1x24x128xf32> to vector<24x128xf32>
    %23 = vector.shape_cast %20 : vector<24x128xf32> to vector<1x24x128xf32>
    tpu.vector_store %arg8[%c0_17, %c0_18, %c0_19], %23 {strides = array<i32>} : memref<6x24x128xf32, #tpu.memory_space<vmem>>, vector<1x24x128xf32>,
    %c1 = arith.constant 1 : index
    %c0_20 = arith.constant 0 : index
    %c0_21 = arith.constant 0 : index
    %24 = vector.load %arg1[%c1, %c0_20, %c0_21] : memref<6x24x64xf32, #tpu.memory_space<vmem>>, vector<1x24x64xf32>
    %25 = vector.shape_cast %24 : vector<1x24x64xf32> to vector<24x64xf32>
    %cst_22 = arith.constant dense<0.000000e+00> : vector<24x32xf32>
    %26 = tpu.matmul %25, %0, %cst_22 {dimension_numbers = #tpu.dot_dimension_numbers<[1], [0], [0], [1], [0, 0, 1, 1], [], []>} : vector<24x64xf32>, vector<64x32xf32>, vector<24x32xf32> -> vector<24x32xf32>
    %27 = arith.addf %26, %5 : vector<24x32xf32>
    %cst_23 = arith.constant dense<0.000000e+00> : vector<24x32xf32>
    %28 = tpu.matmul %16, %1, %cst_23 {dimension_numbers = #tpu.dot_dimension_numbers<[1], [0], [0], [1], [0, 0, 1, 1], [], []>} : vector<24x32xf32>, vector<32x32xf32>, vector<24x32xf32> -> vector<24x32xf32>
    %29 = arith.addf %27, %28 : vector<24x32xf32>
    %30 = math.tanh %29 : vector<24x32xf32>
    %cst_24 = arith.constant dense<0.000000e+00> : vector<24x128xf32>
    %31 = tpu.matmul %30, %2, %cst_24 {dimension_numbers = #tpu.dot_dimension_numbers<[1], [0], [0], [1], [0, 0, 1, 1], [], []>} : vector<24x32xf32>, vector<32x128xf32>, vector<24x128xf32> -> vector<24x128xf32>
    %32 = arith.addf %31, %8 : vector<24x128xf32>
    %cst_25 = arith.constant 0.000000e+00 : f32
    %33 = vector.broadcast %cst_25 : f32 to vector<24x128xf32>
    %34 = arith.maximumf %32, %33 : vector<24x128xf32>
    %c1_26 = arith.constant 1 : index
    %c0_27 = arith.constant 0 : index
    %c0_28 = arith.constant 0 : index
    %35 = vector.load %arg8[%c1_26, %c0_27, %c0_28] : memref<6x24x128xf32, #tpu.memory_space<vmem>>, vector<1x24x128xf32>
    %36 = vector.shape_cast %35 : vector<1x24x128xf32> to vector<24x128xf32>
    %37 = vector.shape_cast %34 : vector<24x128xf32> to vector<1x24x128xf32>
    tpu.vector_store %arg8[%c1_26, %c0_27, %c0_28], %37 {strides = array<i32>} : memref<6x24x128xf32, #tpu.memory_space<vmem>>, vector<1x24x128xf32>,
    %c2 = arith.constant 2 : index
    %c0_29 = arith.constant 0 : index
    %c0_30 = arith.constant 0 : index
    %38 = vector.load %arg1[%c2, %c0_29, %c0_30] : memref<6x24x64xf32, #tpu.memory_space<vmem>>, vector<1x24x64xf32>
    %39 = vector.shape_cast %38 : vector<1x24x64xf32> to vector<24x64xf32>
    %cst_31 = arith.constant dense<0.000000e+00> : vector<24x32xf32>
    %40 = tpu.matmul %39, %0, %cst_31 {dimension_numbers = #tpu.dot_dimension_numbers<[1], [0], [0], [1], [0, 0, 1, 1], [], []>} : vector<24x64xf32>, vector<64x32xf32>, vector<24x32xf32> -> vector<24x32xf32>
    %41 = arith.addf %40, %5 : vector<24x32xf32>
    %cst_32 = arith.constant dense<0.000000e+00> : vector<24x32xf32>
    %42 = tpu.matmul %30, %1, %cst_32 {dimension_numbers = #tpu.dot_dimension_numbers<[1], [0], [0], [1], [0, 0, 1, 1], [], []>} : vector<24x32xf32>, vector<32x32xf32>, vector<24x32xf32> -> vector<24x32xf32>
    %43 = arith.addf %41, %42 : vector<24x32xf32>
    %44 = math.tanh %43 : vector<24x32xf32>
    %cst_33 = arith.constant dense<0.000000e+00> : vector<24x128xf32>
    %45 = tpu.matmul %44, %2, %cst_33 {dimension_numbers = #tpu.dot_dimension_numbers<[1], [0], [0], [1], [0, 0, 1, 1], [], []>} : vector<24x32xf32>, vector<32x128xf32>, vector<24x128xf32> -> vector<24x128xf32>
    %46 = arith.addf %45, %8 : vector<24x128xf32>
    %cst_34 = arith.constant 0.000000e+00 : f32
    %47 = vector.broadcast %cst_34 : f32 to vector<24x128xf32>
    %48 = arith.maximumf %46, %47 : vector<24x128xf32>
    %c2_35 = arith.constant 2 : index
    %c0_36 = arith.constant 0 : index
    %c0_37 = arith.constant 0 : index
    %49 = vector.load %arg8[%c2_35, %c0_36, %c0_37] : memref<6x24x128xf32, #tpu.memory_space<vmem>>, vector<1x24x128xf32>
    %50 = vector.shape_cast %49 : vector<1x24x128xf32> to vector<24x128xf32>
    %51 = vector.shape_cast %48 : vector<24x128xf32> to vector<1x24x128xf32>
    tpu.vector_store %arg8[%c2_35, %c0_36, %c0_37], %51 {strides = array<i32>} : memref<6x24x128xf32, #tpu.memory_space<vmem>>, vector<1x24x128xf32>,
    %c3 = arith.constant 3 : index
    %c0_38 = arith.constant 0 : index
    %c0_39 = arith.constant 0 : index
    %52 = vector.load %arg1[%c3, %c0_38, %c0_39] : memref<6x24x64xf32, #tpu.memory_space<vmem>>, vector<1x24x64xf32>
    %53 = vector.shape_cast %52 : vector<1x24x64xf32> to vector<24x64xf32>
    %cst_40 = arith.constant dense<0.000000e+00> : vector<24x32xf32>
    %54 = tpu.matmul %53, %0, %cst_40 {dimension_numbers = #tpu.dot_dimension_numbers<[1], [0], [0], [1], [0, 0, 1, 1], [], []>} : vector<24x64xf32>, vector<64x32xf32>, vector<24x32xf32> -> vector<24x32xf32>
    %55 = arith.addf %54, %5 : vector<24x32xf32>
    %cst_41 = arith.constant dense<0.000000e+00> : vector<24x32xf32>
    %56 = tpu.matmul %44, %1, %cst_41 {dimension_numbers = #tpu.dot_dimension_numbers<[1], [0], [0], [1], [0, 0, 1, 1], [], []>} : vector<24x32xf32>, vector<32x32xf32>, vector<24x32xf32> -> vector<24x32xf32>
    %57 = arith.addf %55, %56 : vector<24x32xf32>
    %58 = math.tanh %57 : vector<24x32xf32>
    %cst_42 = arith.constant dense<0.000000e+00> : vector<24x128xf32>
    %59 = tpu.matmul %58, %2, %cst_42 {dimension_numbers = #tpu.dot_dimension_numbers<[1], [0], [0], [1], [0, 0, 1, 1], [], []>} : vector<24x32xf32>, vector<32x128xf32>, vector<24x128xf32> -> vector<24x128xf32>
    %60 = arith.addf %59, %8 : vector<24x128xf32>
    %cst_43 = arith.constant 0.000000e+00 : f32
    %61 = vector.broadcast %cst_43 : f32 to vector<24x128xf32>
    %62 = arith.maximumf %60, %61 : vector<24x128xf32>
    %c3_44 = arith.constant 3 : index
    %c0_45 = arith.constant 0 : index
    %c0_46 = arith.constant 0 : index
    %63 = vector.load %arg8[%c3_44, %c0_45, %c0_46] : memref<6x24x128xf32, #tpu.memory_space<vmem>>, vector<1x24x128xf32>
    %64 = vector.shape_cast %63 : vector<1x24x128xf32> to vector<24x128xf32>
    %65 = vector.shape_cast %62 : vector<24x128xf32> to vector<1x24x128xf32>
    tpu.vector_store %arg8[%c3_44, %c0_45, %c0_46], %65 {strides = array<i32>} : memref<6x24x128xf32, #tpu.memory_space<vmem>>, vector<1x24x128xf32>,
    %c4 = arith.constant 4 : index
    %c0_47 = arith.constant 0 : index
    %c0_48 = arith.constant 0 : index
    %66 = vector.load %arg1[%c4, %c0_47, %c0_48] : memref<6x24x64xf32, #tpu.memory_space<vmem>>, vector<1x24x64xf32>
    %67 = vector.shape_cast %66 : vector<1x24x64xf32> to vector<24x64xf32>
    %cst_49 = arith.constant dense<0.000000e+00> : vector<24x32xf32>
    %68 = tpu.matmul %67, %0, %cst_49 {dimension_numbers = #tpu.dot_dimension_numbers<[1], [0], [0], [1], [0, 0, 1, 1], [], []>} : vector<24x64xf32>, vector<64x32xf32>, vector<24x32xf32> -> vector<24x32xf32>
    %69 = arith.addf %68, %5 : vector<24x32xf32>
    %cst_50 = arith.constant dense<0.000000e+00> : vector<24x32xf32>
    %70 = tpu.matmul %58, %1, %cst_50 {dimension_numbers = #tpu.dot_dimension_numbers<[1], [0], [0], [1], [0, 0, 1, 1], [], []>} : vector<24x32xf32>, vector<32x32xf32>, vector<24x32xf32> -> vector<24x32xf32>
    %71 = arith.addf %69, %70 : vector<24x32xf32>
    %72 = math.tanh %71 : vector<24x32xf32>
    %cst_51 = arith.constant dense<0.000000e+00> : vector<24x128xf32>
    %73 = tpu.matmul %72, %2, %cst_51 {dimension_numbers = #tpu.dot_dimension_numbers<[1], [0], [0], [1], [0, 0, 1, 1], [], []>} : vector<24x32xf32>, vector<32x128xf32>, vector<24x128xf32> -> vector<24x128xf32>
    %74 = arith.addf %73, %8 : vector<24x128xf32>
    %cst_52 = arith.constant 0.000000e+00 : f32
    %75 = vector.broadcast %cst_52 : f32 to vector<24x128xf32>
    %76 = arith.maximumf %74, %75 : vector<24x128xf32>
    %c4_53 = arith.constant 4 : index
    %c0_54 = arith.constant 0 : index
    %c0_55 = arith.constant 0 : index
    %77 = vector.load %arg8[%c4_53, %c0_54, %c0_55] : memref<6x24x128xf32, #tpu.memory_space<vmem>>, vector<1x24x128xf32>
    %78 = vector.shape_cast %77 : vector<1x24x128xf32> to vector<24x128xf32>
    %79 = vector.shape_cast %76 : vector<24x128xf32> to vector<1x24x128xf32>
    tpu.vector_store %arg8[%c4_53, %c0_54, %c0_55], %79 {strides = array<i32>} : memref<6x24x128xf32, #tpu.memory_space<vmem>>, vector<1x24x128xf32>,
    %c5 = arith.constant 5 : index
    %c0_56 = arith.constant 0 : index
    %c0_57 = arith.constant 0 : index
    %80 = vector.load %arg1[%c5, %c0_56, %c0_57] : memref<6x24x64xf32, #tpu.memory_space<vmem>>, vector<1x24x64xf32>
    %81 = vector.shape_cast %80 : vector<1x24x64xf32> to vector<24x64xf32>
    %cst_58 = arith.constant dense<0.000000e+00> : vector<24x32xf32>
    %82 = tpu.matmul %81, %0, %cst_58 {dimension_numbers = #tpu.dot_dimension_numbers<[1], [0], [0], [1], [0, 0, 1, 1], [], []>} : vector<24x64xf32>, vector<64x32xf32>, vector<24x32xf32> -> vector<24x32xf32>
    %83 = arith.addf %82, %5 : vector<24x32xf32>
    %cst_59 = arith.constant dense<0.000000e+00> : vector<24x32xf32>
    %84 = tpu.matmul %72, %1, %cst_59 {dimension_numbers = #tpu.dot_dimension_numbers<[1], [0], [0], [1], [0, 0, 1, 1], [], []>} : vector<24x32xf32>, vector<32x32xf32>, vector<24x32xf32> -> vector<24x32xf32>
    %85 = arith.addf %83, %84 : vector<24x32xf32>
    %86 = math.tanh %85 : vector<24x32xf32>
    %cst_60 = arith.constant dense<0.000000e+00> : vector<24x128xf32>
    %87 = tpu.matmul %86, %2, %cst_60 {dimension_numbers = #tpu.dot_dimension_numbers<[1], [0], [0], [1], [0, 0, 1, 1], [], []>} : vector<24x32xf32>, vector<32x128xf32>, vector<24x128xf32> -> vector<24x128xf32>
    %88 = arith.addf %87, %8 : vector<24x128xf32>
    %cst_61 = arith.constant 0.000000e+00 : f32
    %89 = vector.broadcast %cst_61 : f32 to vector<24x128xf32>
    %90 = arith.maximumf %88, %89 : vector<24x128xf32>
    %c5_62 = arith.constant 5 : index
    %c0_63 = arith.constant 0 : index
    %c0_64 = arith.constant 0 : index
    %91 = vector.load %arg8[%c5_62, %c0_63, %c0_64] : memref<6x24x128xf32, #tpu.memory_space<vmem>>, vector<1x24x128xf32>
    %92 = vector.shape_cast %91 : vector<1x24x128xf32> to vector<24x128xf32>
    %93 = vector.shape_cast %90 : vector<24x128xf32> to vector<1x24x128xf32>
    tpu.vector_store %arg8[%c5_62, %c0_63, %c0_64], %93 {strides = array<i32>} : memref<6x24x128xf32, #tpu.memory_space<vmem>>, vector<1x24x128xf32>,
    return
  }
  func.func @transform_0(%arg0: i32) -> (i32, i32, i32) {
    %c0_i32 = arith.constant 0 : i32
    %c0_i32_0 = arith.constant 0 : i32
    %c0_i32_1 = arith.constant 0 : i32
    %c0_i32_2 = arith.constant 0 : i32
    return %c0_i32, %c0_i32_0, %c0_i32_1 : i32, i32, i32
  }
  func.func @transform_1(%arg0: i32) -> (i32, i32) {
    %c0_i32 = arith.constant 0 : i32
    %c0_i32_0 = arith.constant 0 : i32
    %c0_i32_1 = arith.constant 0 : i32
    return %c0_i32, %c0_i32_0 : i32, i32
  }
  func.func @transform_2(%arg0: i32) -> (i32, i32) {
    %c0_i32 = arith.constant 0 : i32
    %c0_i32_0 = arith.constant 0 : i32
    %c0_i32_1 = arith.constant 0 : i32
    return %c0_i32, %c0_i32_0 : i32, i32
  }
  func.func @transform_3(%arg0: i32) -> (i32, i32) {
    %c0_i32 = arith.constant 0 : i32
    %c0_i32_0 = arith.constant 0 : i32
    %c0_i32_1 = arith.constant 0 : i32
    return %c0_i32, %c0_i32_0 : i32, i32
  }
  func.func @transform_4(%arg0: i32) -> (i32, i32) {
    %c0_i32 = arith.constant 0 : i32
    %c0_i32_0 = arith.constant 0 : i32
    %c0_i32_1 = arith.constant 0 : i32
    return %c0_i32, %c0_i32_0 : i32, i32
  }
  func.func @transform_5(%arg0: i32) -> (i32, i32) {
    %c0_i32 = arith.constant 0 : i32
    %c0_i32_0 = arith.constant 0 : i32
    %c0_i32_1 = arith.constant 0 : i32
    return %c0_i32, %c0_i32_0 : i32, i32
  }
  func.func @transform_6(%arg0: i32) -> (i32, i32) {
    %c0_i32 = arith.constant 0 : i32
    %c0_i32_0 = arith.constant 0 : i32
    %c0_i32_1 = arith.constant 0 : i32
    return %c0_i32, %c0_i32_0 : i32, i32
  }
  func.func @transform_7(%arg0: i32) -> (i32, i32, i32) {
    %c0_i32 = arith.constant 0 : i32
    %c0_i32_0 = arith.constant 0 : i32
    %c0_i32_1 = arith.constant 0 : i32
    %c0_i32_2 = arith.constant 0 : i32
    return %c0_i32, %c0_i32_0, %c0_i32_1 : i32, i32, i32
  }
}

</mosaic_0001>

<bundles_post_ra>
// kernel: tpu_custom_call.1
= control target key start
LH: loop header
LB: loop body
LE: loop exit
PB: predicated region body
PF: predicated region fallthrough
CT: control target
= control target key end

     0   :  { %12 = vsyncpa [#allocation3], 0  ;;  %s3053_s0 = inlined_call_operand.hbm [shape: f32[6,24,64], index: 0, kind: input, shape index: {}]   ;;  %s3054_s1 = inlined_call_operand.vmem [shape: f32[24,32], index: 1, kind: input, shape index: {}]   ;;  %s3055_s2 = inlined_call_operand.vmem [shape: f32[64,32], index: 2, kind: input, shape index: {}]   ;;  %s3056_s3 = inlined_call_operand.vmem [shape: f32[32,32], index: 3, kind: input, shape index: {}]   ;;  %s3057_s4 = inlined_call_operand.vmem [shape: f32[1,32], index: 4, kind: input, shape index: {}]   ;;  %s3058_s5 = inlined_call_operand.vmem [shape: f32[32,128], index: 5, kind: input, shape index: {}]   ;;  %s3059_s6 = inlined_call_operand.vmem [shape: f32[1,128], index: 6, kind: input, shape index: {}]   ;;  %s3060_s7 = inlined_call_operand.hbm [shape: f32[6,24,128], index: 7, kind: output, shape index: {}]  }
   0x1   :  { %13 = vsyncpa [#allocation4], 0  ;;  %s2599_s24 = smov [#allocation2]   ;;  %s2551_s28 = scalar_lea.hbm %s3053_s0, 2304 }
   0x2   :  { %s19_s25 = sshll.u32 %s2599_s24, 4  ;;  %p2552_p0 = scmp.ne.s32.totalorder %s3053_s0, %s2551_s28  ;;  %s20_s25 = int_to_ptr.vmem [resolvable:$true] %s19_s25 }
   0x3   :  { %p2555_p1 = scmp.lt.u32.totalorder %s2551_s28, %s3053_s0 }
   0x5   :  { %p2557_p2 = pnand %p2555_p1, %p2552_p0 }
   0x7   :  { %2560 = shalt.err (!%p2557_p2)
}
   0x8   :  { %s2561_s10 = scalar_lea.vmem %s20_s25, 2304  ;;  %p2566_p4 = scmp.lt.s32.totalorder %s20_s25, %s20_s25 }
   0x9   :  { %p2562_p3 = scmp.ne.s32.totalorder %s20_s25, %s2561_s10  ;;  %p2567_p5 = scmp.lt.s32.totalorder %s2561_s10, %s2561_s10 }
   0xb   :  { %p2568_p6 = por %p2567_p5, %p2566_p4 }
   0xd   :  { %p2569_p7 = pnand %p2568_p6, %p2562_p3 }
   0xf   :  { %2572 = shalt.err (!%p2569_p7)
}
  0x10   :  { %s2600_s11 = smov 128   ;;  %s2601_s12 = smov 8  }
  0x11   :  { %25 = dma.hbm_to_vmem [thread:$0]  %s3053_s0, 2304, %s20_s25, [#allocation3], %s2600_s11, %s2600_s11, %s2601_s12  }
  0x12   :  { %2595 = dma.done.wait [#allocation3], 2304  }
  0x13   :  { %2596 = vsyncadd [#allocation3], 4294964992  ;;  %v2602_v0 = vmov 0.0|0.0   ;;  %vm2603_vm0 = vmmov 0   ;;  %v2604_v1 = vmov 0.0   ;;  %v41_v2 = vld [vmem:[%s3055_s2] sm:$0xff] }
  0x14   :  { %2310 = vmatprep.subr.bf16.mxu0 %v2602_v0  ;;  %1972 = vmatprep.mubr.msk.f32.mxu0 %vm2603_vm0, %v2604_v1  ;;  %v42_v3 = vld [vmem:[%s3055_s2 + $0x8] sm:$0xff]  ;;  %v43_v4 = vld [vmem:[%s3055_s2 + $0x10] sm:$0xff]  ;;  %v44_v6 = vld [vmem:[%s3055_s2 + $0x18] sm:$0xff]  ;;  %vm77_vm1 = vcmask 523264   ;;  %vm167_vm2 = vcmask 261120  }
  0x15   :  { %2328 = vmatprep.subr.bf16.mxu1 %v2602_v0  ;;  %2006 = vmatprep.mubr.msk.f32.mxu1 %vm2603_vm0, %v2604_v1  ;;  %v2676_v5 = vpack.c.bf16 %v42_v3, %v41_v2  ;;  %v2682_v7 = vpack.c.bf16 %v44_v6, %v43_v4  ;;  %v45_v8 = vld [vmem:[%s3055_s2 + $0x20] sm:$0xff]  ;;  %v46_v9 = vld [vmem:[%s3055_s2 + $0x28] sm:$0xff]  ;;  %v47_v11 = vld [vmem:[%s3055_s2 + $0x30] sm:$0xff] }
  0x16   :  { %v2692_v10 = vpack.c.bf16 %v46_v9, %v45_v8  ;;  %v48_v12 = vld [vmem:[%s3055_s2 + $0x38] sm:$0xff]  ;;  %v49_v14 = vld [vmem:[%s3056_s3] sm:$0xff]  ;;  %v50_v15 = vld [vmem:[%s3056_s3 + $0x8] sm:$0xff] }
  0x17   :  { %2312 = vmatpush3.bf16.msra.mxu0 %v2676_v5  ;;  %v2702_v13 = vpack.c.bf16 %v48_v12, %v47_v11  ;;  %v74_v16 = vld [vmem:[#allocation2] sm:$0xff]  ;;  %v2712_v17 = vpack.c.bf16 %v50_v15, %v49_v14  ;;  %v51_v18 = vld [vmem:[%s3056_s3 + $0x10] sm:$0xff]  ;;  %v52_v19 = vld [vmem:[%s3056_s3 + $0x18] sm:$0xff] }
  0x18   :  { %2313 = vmatprep.subr.bf16.mxu0 %v2602_v0  ;;  %v75_v20 = vld [vmem:[#allocation2 + $0x8] sm:$0xff]  ;;  %v2725_v21 = vpack.c.bf16 %v52_v19, %v51_v18  ;;  %v76_v22 = vld [vmem:[#allocation2 + $0x10] sm:$0xff]  ;;  %v71_v23 = vld [vmem:[%s3054_s1] sm:$0xff] }
  0x19   :  { %v72_v24 = vld [vmem:[%s3054_s1 + $0x8] sm:$0xff]  ;;  %v73_v25 = vld [vmem:[%s3054_s1 + $0x10] sm:$0xff]  ;;  %v53_v26 = vld [vmem:[%s3058_s5] sm:$0xff] }
  0x1a   :  { %v54_v27 = vld [vmem:[%s3058_s5 + $0x8] sm:$0xff]  ;;  %v55_v29 = vld [vmem:[%s3058_s5 + $0x10] sm:$0xff]  ;;  %v56_v30 = vld [vmem:[%s3058_s5 + $0x18] sm:$0xff] }
  0x1b   :  { %2315 = vmatpush3.bf16.msra.mxu0 %v2682_v7  ;;  %v2760_v28 = vpack.c.bf16 %v54_v27, %v53_v26  ;;  %v2772_v31 = vpack.c.bf16 %v56_v30, %v55_v29  ;;  %v2781_v32 = vld [vmem:[%s3057_s4] ss:$0 sm:$0xff]  ;;  %v359_v45 = vld [vmem:[#allocation2 + $0x18] sm:$0xff]  ;;  %v361_v47 = vld [vmem:[#allocation2 + $0x28] sm:$0xff] }
  0x1c   :  { %2316 = vmatprep.subr.bf16.mxu0 %v2602_v0  ;;  %v360_v46 = vld [vmem:[#allocation2 + $0x20] sm:$0xff]  ;;  %v634_v48 = vld [vmem:[#allocation2 + $0x30] sm:$0xff]  ;;  %v635_v49 = vld [vmem:[#allocation2 + $0x38] sm:$0xff] }
  0x1d   :  { %2330 = vmatpush3.bf16.msra.mxu1 %v2760_v28  ;;  %v636_v50 = vld [vmem:[#allocation2 + $0x40] sm:$0xff] }
  0x1e   :  { %2331 = vmatprep.subr.bf16.mxu1 %v2602_v0  ;;  %v2849_v51 = vld [vmem:[%s3059_s6] ss:$0 sm:$0xff]  ;;  %s2605_s6 = smov [#allocation5]  }
  0x1f   :  { %2318 = vmatpush3.bf16.msra.mxu0 %v2692_v10  ;;  %s1738_s29 = sshll.u32 %s2605_s6, 4  ;;  %s1739_s29 = int_to_ptr.vmem [resolvable:$true] %s1738_s29 }
  0x20   :  { %2319 = vmatprep.subr.bf16.mxu0 %v2602_v0  ;;  %s2573_s30 = scalar_lea.vmem %s1739_s29, 2304  ;;  %p2578_p9 = scmp.lt.s32.totalorder %s1739_s29, %s1739_s29 }
  0x21   :  { %2333 = vmatpush3.bf16.msra.mxu1 %v2772_v31  ;;  %p2574_p8 = scmp.ne.s32.totalorder %s1739_s29, %s2573_s30  ;;  %p2579_p10 = scmp.lt.s32.totalorder %s2573_s30, %s2573_s30 }
  0x22   :  { %2334 = vmatprep.subr.bf16.mxu1 %v2602_v0 }
  0x23   :  { %2321 = vmatpush3.bf16.msra.mxu0 %v2702_v13  ;;  %p2580_p11 = por %p2579_p10, %p2578_p9 }
  0x24   :  { %2322 = vmatprep.subr.bf16.mxu0 %v2602_v0 }
  0x25   :  { %p2581_p12 = pnand %p2580_p11, %p2574_p8 }
  0x26   :  { %1973 = vmatmul.mubr.msk.f32.vlgmr.msra.gmra.mrb[0].mxu0 %vm77_vm1, %v74_v16 }
  0x27   :  { %2324 = vmatpush3.bf16.msra.mxu0 %v2712_v17  ;;  %1975 = vmatprep.mubr.msk.f32.mxu0 %vm2603_vm0, %v2604_v1 }
  0x28   :  { %2325 = vmatprep.subr.bf16.mxu0 %v2602_v0 }
  0x2a   :  { %1976 = vmatmul.mubr.msk.f32.gmra.mrb[2].mxu0 %vm77_vm1, %v75_v20 }
  0x2b   :  { %1978 = vmatprep.mubr.msk.f32.mxu0 %vm2603_vm0, %v2604_v1  ;;  %2327 = vmatpush3.bf16.msra.mxu0 %v2725_v21 }
  0x2c   :  { %2352 = vmatprep.subr.bf16.mxu0 %v2602_v0 }
  0x2e   :  { %1979 = vmatmul.mubr.msk.f32.gmra.mrb[4].mxu0 %vm77_vm1, %v76_v22 }
  0x2f   :  { %1989 = vmatprep.mubr.msk.f32.mxu0 %vm2603_vm0, %v2604_v1 }
  0x32   :  { %1990 = vmatmul.mubr.msk.f32.vlgmr.msra.gmra.mrb[0].mxu0 %vm167_vm2, %v71_v23 }
  0x33   :  { %1992 = vmatprep.mubr.msk.f32.mxu0 %vm2603_vm0, %v2604_v1  ;;  %2354 = vmatpush3.bf16.msra.mxu0 %v2760_v28 }
  0x34   :  { %2355 = vmatprep.subr.bf16.mxu0 %v2602_v0 }
  0x36   :  { %1993 = vmatmul.mubr.msk.f32.gmra.mrb[2].mxu0 %vm167_vm2, %v72_v24 }
  0x37   :  { %1995 = vmatprep.mubr.msk.f32.mxu0 %vm2603_vm0, %v2604_v1  ;;  %2357 = vmatpush3.bf16.msra.mxu0 %v2772_v31 }
  0x38   :  { %2376 = vmatprep.subr.bf16.mxu0 %v2602_v0 }
  0x3a   :  { %1996 = vmatmul.mubr.msk.f32.gmra.mrb[4].mxu0 %vm167_vm2, %v73_v25 }
  0x3b   :  { %2065 = vmatprep.mubr.msk.f32.mxu0 %vm2603_vm0, %v2604_v1 }
 0x105   :  { %v243_v33 = vpop.f32.mrb[0].mxu0 }
 0x106   :  { %v2454_v34 = vadd.f32 %v2781_v32, %v243_v33  ;;  %v1991_v35 = vpop.f32.mrb[1].mxu0 }
 0x108   :  { %2515 = vtanh.f32 %v2454_v34 }
 0x109   :  { %v248_v36 = vpop.f32.mrb[2].mxu0 }
 0x10a   :  { %v2455_v37 = vadd.f32 %v2781_v32, %v248_v36  ;;  %v1994_v38 = vpop.f32.mrb[3].mxu0 }
 0x10c   :  { %2517 = vtanh.f32 %v2455_v37 }
 0x10d   :  { %v253_v39 = vpop.f32.mrb[4].mxu0 }
 0x10e   :  { %v2456_v40 = vadd.f32 %v2781_v32, %v253_v39  ;;  %v1997_v41 = vpop.f32.mrb[5].mxu0 }
 0x110   :  { %2519 = vtanh.f32 %v2456_v40 }
 0x112   :  { %v2516_v42 = vpop.eup %2515 }
 0x113   :  { %2007 = vmatmul.mubr.msk.f32.vlgmr.msra.gmra.mrb[0].mxu1 %vm167_vm2, %v2516_v42 }
 0x114   :  { %2336 = vmatpush3.bf16.msra.mxu1 %v2676_v5  ;;  %2009 = vmatprep.mubr.msk.f32.mxu1 %vm2603_vm0, %v2604_v1 }
 0x115   :  { %2337 = vmatprep.subr.bf16.mxu1 %v2602_v0 }
 0x116   :  { %v2518_v43 = vpop.eup %2517 }
 0x117   :  { %2010 = vmatmul.mubr.msk.f32.gmra.mrb[2].mxu1 %vm167_vm2, %v2518_v43 }
 0x118   :  { %2339 = vmatpush3.bf16.msra.mxu1 %v2682_v7  ;;  %2012 = vmatprep.mubr.msk.f32.mxu1 %vm2603_vm0, %v2604_v1 }
 0x119   :  { %2340 = vmatprep.subr.bf16.mxu1 %v2602_v0 }
 0x11a   :  { %v2520_v44 = vpop.eup %2519 }
 0x11b   :  { %2013 = vmatmul.mubr.msk.f32.gmra.mrb[4].mxu1 %vm167_vm2, %v2520_v44 }
 0x11c   :  { %2342 = vmatpush3.bf16.msra.mxu1 %v2692_v10  ;;  %2031 = vmatprep.mubr.msk.f32.mxu1 %vm2603_vm0, %v2604_v1 }
 0x11d   :  { %2343 = vmatprep.subr.bf16.mxu1 %v2602_v0 }
 0x120   :  { %2345 = vmatpush3.bf16.msra.mxu1 %v2702_v13 }
 0x121   :  { %2346 = vmatprep.subr.bf16.mxu1 %v2602_v0 }
 0x123   :  { %2032 = vmatmul.mubr.msk.f32.vlgmr.msra.gmra.mrb[6].mxu1 %vm77_vm1, %v359_v45 }
 0x124   :  { %2348 = vmatpush3.bf16.msra.mxu1 %v2712_v17  ;;  %2034 = vmatprep.mubr.msk.f32.mxu1 %vm2603_vm0, %v2604_v1 }
 0x125   :  { %2349 = vmatprep.subr.bf16.mxu1 %v2602_v0 }
 0x127   :  { %2035 = vmatmul.mubr.msk.f32.gmra.mrb[8].mxu1 %vm77_vm1, %v360_v46 }
 0x128   :  { %2037 = vmatprep.mubr.msk.f32.mxu1 %vm2603_vm0, %v2604_v1  ;;  %2351 = vmatpush3.bf16.msra.mxu1 %v2725_v21 }
 0x129   :  { %2358 = vmatprep.subr.bf16.mxu1 %v2602_v0 }
 0x12b   :  { %2038 = vmatmul.mubr.msk.f32.gmra.mrb[10].mxu1 %vm77_vm1, %v361_v47  ;;  %v909_v47 = vld [vmem:[#allocation2 + $0x48] sm:$0xff] }
 0x12c   :  { %2048 = vmatprep.mubr.msk.f32.mxu1 %vm2603_vm0, %v2604_v1 }
 0x12f   :  { %2049 = vmatmul.mubr.msk.f32.vlgmr.msra.gmra.mrb[6].mxu1 %vm167_vm2, %v2516_v42 }
 0x130   :  { %2051 = vmatprep.mubr.msk.f32.mxu1 %vm2603_vm0, %v2604_v1  ;;  %2360 = vmatpush3.bf16.msra.mxu1 %v2676_v5 }
 0x131   :  { %2361 = vmatprep.subr.bf16.mxu1 %v2602_v0 }
 0x133   :  { %2052 = vmatmul.mubr.msk.f32.gmra.mrb[8].mxu1 %vm167_vm2, %v2518_v43 }
 0x134   :  { %2054 = vmatprep.mubr.msk.f32.mxu1 %vm2603_vm0, %v2604_v1  ;;  %2363 = vmatpush3.bf16.msra.mxu1 %v2682_v7 }
 0x135   :  { %2364 = vmatprep.subr.bf16.mxu1 %v2602_v0 }
 0x137   :  { %2055 = vmatmul.mubr.msk.f32.gmra.mrb[10].mxu1 %vm167_vm2, %v2520_v44 }
 0x138   :  { %2366 = vmatpush3.bf16.msra.mxu1 %v2692_v10  ;;  %2090 = vmatprep.mubr.msk.f32.mxu1 %vm2603_vm0, %v2604_v1 }
 0x139   :  { %2367 = vmatprep.subr.bf16.mxu1 %v2602_v0 }
 0x13c   :  { %2369 = vmatpush3.bf16.msra.mxu1 %v2702_v13 }
 0x13d   :  { %2370 = vmatprep.subr.bf16.mxu1 %v2602_v0 }
 0x13f   :  { %2091 = vmatmul.mubr.msk.f32.vlgmr.msra.gmra.mrb[12].mxu1 %vm77_vm1, %v634_v48  ;;  %v910_v48 = vld [vmem:[#allocation2 + $0x50] sm:$0xff] }
 0x140   :  { %2372 = vmatpush3.bf16.msra.mxu1 %v2712_v17  ;;  %2093 = vmatprep.mubr.msk.f32.mxu1 %vm2603_vm0, %v2604_v1 }
 0x141   :  { %2373 = vmatprep.subr.bf16.mxu1 %v2602_v0 }
 0x143   :  { %2094 = vmatmul.mubr.msk.f32.gmra.mrb[14].mxu1 %vm77_vm1, %v635_v49  ;;  %v911_v49 = vld [vmem:[#allocation2 + $0x58] sm:$0xff] }
 0x144   :  { %2096 = vmatprep.mubr.msk.f32.mxu1 %vm2603_vm0, %v2604_v1  ;;  %2375 = vmatpush3.bf16.msra.mxu1 %v2725_v21 }
 0x145   :  { %2400 = vmatprep.subr.bf16.mxu1 %v2602_v0 }
 0x147   :  { %2097 = vmatmul.mubr.msk.f32.gmra.mrb[16].mxu1 %vm77_vm1, %v636_v50 }
 0x148   :  { %2107 = vmatprep.mubr.msk.f32.mxu1 %vm2603_vm0, %v2604_v1 }
 0x1e6   :  { %v338_v52 = vpop.f32.mrb[0].mxu1 }
 0x1e7   :  { %v339_v53 = vadd.f32 %v2849_v51, %v338_v52  ;;  %v2008_v54 = vpop.f32.mrb[1].mxu1 }
 0x1e9   :  { %v352_v55 = vmax.f32 %v339_v53, 0.0 }
 0x1ea   :  { %v343_v56 = vpop.f32.mrb[2].mxu1 }
 0x1eb   :  { %355 = vst [vmem:[#allocation5] sm:$0xff] %v352_v55  ;;  %v344_v57 = vadd.f32 %v2849_v51, %v343_v56  ;;  %v2011_v58 = vpop.f32.mrb[3].mxu1 }
 0x1ed   :  { %v353_v59 = vmax.f32 %v344_v57, 0.0 }
 0x1ee   :  { %v348_v60 = vpop.f32.mrb[4].mxu1 }
 0x1ef   :  { %356 = vst [vmem:[#allocation5 + $0x8] sm:$0xff] %v353_v59  ;;  %v349_v61 = vadd.f32 %v2849_v51, %v348_v60  ;;  %v2014_v62 = vpop.f32.mrb[5].mxu1 }
 0x1f1   :  { %v354_v63 = vmax.f32 %v349_v61, 0.0 }
 0x1f3   :  { %357 = vst [vmem:[#allocation5 + $0x10] sm:$0xff] %v354_v63 }
 0x202   :  { %v517_v2 = vpop.f32.mrb[6].mxu1 }
 0x203   :  { %v2457_v3 = vadd.f32 %v2781_v32, %v517_v2  ;;  %v2050_v4 = vpop.f32.mrb[7].mxu1 }
 0x205   :  { %2521 = vtanh.f32 %v2457_v3 }
 0x206   :  { %v522_v6 = vpop.f32.mrb[8].mxu1 }
 0x207   :  { %v2458_v8 = vadd.f32 %v2781_v32, %v522_v6  ;;  %v2053_v9 = vpop.f32.mrb[9].mxu1 }
 0x209   :  { %2523 = vtanh.f32 %v2458_v8 }
 0x20a   :  { %v527_v11 = vpop.f32.mrb[10].mxu1 }
 0x20b   :  { %v2459_v12 = vadd.f32 %v2781_v32, %v527_v11  ;;  %v2056_v14 = vpop.f32.mrb[11].mxu1 }
 0x20d   :  { %2525 = vtanh.f32 %v2459_v12 }
 0x20f   :  { %v2522_v15 = vpop.eup %2521 }
 0x210   :  { %2066 = vmatmul.mubr.msk.f32.vlgmr.msra.gmra.mrb[6].mxu0 %vm167_vm2, %v2522_v15  ;;  %2108 = vmatmul.mubr.msk.f32.vlgmr.msra.gmra.mrb[12].mxu1 %vm167_vm2, %v2522_v15 }
 0x211   :  { %2068 = vmatprep.mubr.msk.f32.mxu0 %vm2603_vm0, %v2604_v1  ;;  %2110 = vmatprep.mubr.msk.f32.mxu1 %vm2603_vm0, %v2604_v1 }
 0x212   :  { %2378 = vmatpush3.bf16.msra.mxu0 %v2760_v28  ;;  %2402 = vmatpush3.bf16.msra.mxu1 %v2760_v28 }
 0x213   :  { %v2524_v16 = vpop.eup %2523  ;;  %2379 = vmatprep.subr.bf16.mxu0 %v2602_v0  ;;  %2403 = vmatprep.subr.bf16.mxu1 %v2602_v0 }
 0x214   :  { %2069 = vmatmul.mubr.msk.f32.gmra.mrb[8].mxu0 %vm167_vm2, %v2524_v16  ;;  %2111 = vmatmul.mubr.msk.f32.gmra.mrb[14].mxu1 %vm167_vm2, %v2524_v16 }
 0x215   :  { %2071 = vmatprep.mubr.msk.f32.mxu0 %vm2603_vm0, %v2604_v1  ;;  %2113 = vmatprep.mubr.msk.f32.mxu1 %vm2603_vm0, %v2604_v1 }
 0x216   :  { %2381 = vmatpush3.bf16.msra.mxu0 %v2772_v31  ;;  %2405 = vmatpush3.bf16.msra.mxu1 %v2772_v31 }
 0x217   :  { %v2526_v18 = vpop.eup %2525  ;;  %2382 = vmatprep.subr.bf16.mxu0 %v2602_v0  ;;  %2406 = vmatprep.subr.bf16.mxu1 %v2602_v0 }
 0x218   :  { %2072 = vmatmul.mubr.msk.f32.gmra.mrb[10].mxu0 %vm167_vm2, %v2526_v18  ;;  %2114 = vmatmul.mubr.msk.f32.gmra.mrb[16].mxu1 %vm167_vm2, %v2526_v18  ;;  %v1184_v18 = vld [vmem:[#allocation2 + $0x60] sm:$0xff] }
 0x219   :  { %2124 = vmatprep.mubr.msk.f32.mxu0 %vm2603_vm0, %v2604_v1  ;;  %2183 = vmatprep.mubr.msk.f32.mxu1 %vm2603_vm0, %v2604_v1 }
 0x2e3   :  { %v612_v19 = vpop.f32.mrb[6].mxu0  ;;  %v792_v20 = vpop.f32.mrb[12].mxu1 }
 0x2e4   :  { %v613_v22 = vadd.f32 %v2849_v51, %v612_v19  ;;  %v2460_v23 = vadd.f32 %v2781_v32, %v792_v20  ;;  %v2067_v24 = vpop.f32.mrb[7].mxu0  ;;  %v2109_v25 = vpop.f32.mrb[13].mxu1  ;;  %v1185_v19 = vld [vmem:[#allocation2 + $0x68] sm:$0xff]  ;;  %v1186_v20 = vld [vmem:[#allocation2 + $0x70] sm:$0xff] }
 0x2e6   :  { %v626_v26 = vmax.f32 %v613_v22, 0.0  ;;  %2527 = vtanh.f32 %v2460_v23 }
 0x2e7   :  { %v617_v27 = vpop.f32.mrb[8].mxu0  ;;  %v797_v29 = vpop.f32.mrb[14].mxu1 }
 0x2e8   :  { %630 = vst [vmem:[#allocation5 + $0x18] sm:$0xff] %v626_v26  ;;  %v618_v30 = vadd.f32 %v2849_v51, %v617_v27  ;;  %v2461_v33 = vadd.f32 %v2781_v32, %v797_v29  ;;  %v2070_v34 = vpop.f32.mrb[9].mxu0  ;;  %v2112_v35 = vpop.f32.mrb[15].mxu1 }
 0x2ea   :  { %v627_v36 = vmax.f32 %v618_v30, 0.0  ;;  %2529 = vtanh.f32 %v2461_v33 }
 0x2eb   :  { %v622_v37 = vpop.f32.mrb[10].mxu0  ;;  %v802_v38 = vpop.f32.mrb[16].mxu1 }
 0x2ec   :  { %631 = vst [vmem:[#allocation5 + $0x20] sm:$0xff] %v627_v36  ;;  %v623_v39 = vadd.f32 %v2849_v51, %v622_v37  ;;  %v2462_v40 = vadd.f32 %v2781_v32, %v802_v38  ;;  %v2073_v41 = vpop.f32.mrb[11].mxu0  ;;  %v2115_v42 = vpop.f32.mrb[17].mxu1 }
 0x2ee   :  { %v628_v43 = vmax.f32 %v623_v39, 0.0  ;;  %2531 = vtanh.f32 %v2462_v40 }
 0x2f0   :  { %v2528_v44 = vpop.eup %2527  ;;  %632 = vst [vmem:[#allocation5 + $0x28] sm:$0xff] %v628_v43 }
 0x2f1   :  { %2125 = vmatmul.mubr.msk.f32.vlgmr.msra.gmra.mrb[12].mxu0 %vm167_vm2, %v2528_v44 }
 0x2f2   :  { %2384 = vmatpush3.bf16.msra.mxu0 %v2676_v5  ;;  %2127 = vmatprep.mubr.msk.f32.mxu0 %vm2603_vm0, %v2604_v1 }
 0x2f3   :  { %2385 = vmatprep.subr.bf16.mxu0 %v2602_v0 }
 0x2f4   :  { %v2530_v45 = vpop.eup %2529 }
 0x2f5   :  { %2128 = vmatmul.mubr.msk.f32.gmra.mrb[14].mxu0 %vm167_vm2, %v2530_v45 }
 0x2f6   :  { %2387 = vmatpush3.bf16.msra.mxu0 %v2682_v7  ;;  %2130 = vmatprep.mubr.msk.f32.mxu0 %vm2603_vm0, %v2604_v1 }
 0x2f7   :  { %2388 = vmatprep.subr.bf16.mxu0 %v2602_v0 }
 0x2f8   :  { %v2532_v46 = vpop.eup %2531 }
 0x2f9   :  { %2131 = vmatmul.mubr.msk.f32.gmra.mrb[16].mxu0 %vm167_vm2, %v2532_v46 }
 0x2fa   :  { %2390 = vmatpush3.bf16.msra.mxu0 %v2692_v10  ;;  %2149 = vmatprep.mubr.msk.f32.mxu0 %vm2603_vm0, %v2604_v1 }
 0x2fb   :  { %2391 = vmatprep.subr.bf16.mxu0 %v2602_v0 }
 0x2fe   :  { %2393 = vmatpush3.bf16.msra.mxu0 %v2702_v13 }
 0x2ff   :  { %2394 = vmatprep.subr.bf16.mxu0 %v2602_v0 }
 0x301   :  { %2150 = vmatmul.mubr.msk.f32.vlgmr.msra.gmra.mrb[18].mxu0 %vm77_vm1, %v909_v47 }
 0x302   :  { %2396 = vmatpush3.bf16.msra.mxu0 %v2712_v17  ;;  %2152 = vmatprep.mubr.msk.f32.mxu0 %vm2603_vm0, %v2604_v1 }
 0x303   :  { %2397 = vmatprep.subr.bf16.mxu0 %v2602_v0 }
 0x305   :  { %2153 = vmatmul.mubr.msk.f32.gmra.mrb[20].mxu0 %vm77_vm1, %v910_v48 }
 0x306   :  { %2155 = vmatprep.mubr.msk.f32.mxu0 %vm2603_vm0, %v2604_v1  ;;  %2399 = vmatpush3.bf16.msra.mxu0 %v2725_v21 }
 0x307   :  { %2424 = vmatprep.subr.bf16.mxu0 %v2602_v0 }
 0x309   :  { %2156 = vmatmul.mubr.msk.f32.gmra.mrb[22].mxu0 %vm77_vm1, %v911_v49 }
 0x30a   :  { %2166 = vmatprep.mubr.msk.f32.mxu0 %vm2603_vm0, %v2604_v1 }
 0x30d   :  { %2167 = vmatmul.mubr.msk.f32.vlgmr.msra.gmra.mrb[18].mxu0 %vm167_vm2, %v2528_v44 }
 0x30e   :  { %2169 = vmatprep.mubr.msk.f32.mxu0 %vm2603_vm0, %v2604_v1  ;;  %2426 = vmatpush3.bf16.msra.mxu0 %v2760_v28 }
 0x30f   :  { %2427 = vmatprep.subr.bf16.mxu0 %v2602_v0 }
 0x311   :  { %2170 = vmatmul.mubr.msk.f32.gmra.mrb[20].mxu0 %vm167_vm2, %v2530_v45 }
 0x312   :  { %2172 = vmatprep.mubr.msk.f32.mxu0 %vm2603_vm0, %v2604_v1  ;;  %2429 = vmatpush3.bf16.msra.mxu0 %v2772_v31 }
 0x313   :  { %2430 = vmatprep.subr.bf16.mxu0 %v2602_v0 }
 0x315   :  { %2173 = vmatmul.mubr.msk.f32.gmra.mrb[22].mxu0 %vm167_vm2, %v2532_v46 }
 0x316   :  { %2242 = vmatprep.mubr.msk.f32.mxu0 %vm2603_vm0, %v2604_v1 }
 0x3c4   :  { %v887_v50 = vpop.f32.mrb[12].mxu0 }
 0x3c5   :  { %v888_v52 = vadd.f32 %v2849_v51, %v887_v50  ;;  %v2126_v53 = vpop.f32.mrb[13].mxu0 }
 0x3c7   :  { %v901_v54 = vmax.f32 %v888_v52, 0.0 }
 0x3c8   :  { %v892_v55 = vpop.f32.mrb[14].mxu0 }
 0x3c9   :  { %905 = vst [vmem:[#allocation5 + $0x30] sm:$0xff] %v901_v54  ;;  %v893_v56 = vadd.f32 %v2849_v51, %v892_v55  ;;  %v2129_v57 = vpop.f32.mrb[15].mxu0 }
 0x3cb   :  { %v902_v58 = vmax.f32 %v893_v56, 0.0 }
 0x3cc   :  { %v897_v59 = vpop.f32.mrb[16].mxu0 }
 0x3cd   :  { %906 = vst [vmem:[#allocation5 + $0x38] sm:$0xff] %v902_v58  ;;  %v898_v60 = vadd.f32 %v2849_v51, %v897_v59  ;;  %v2132_v61 = vpop.f32.mrb[17].mxu0 }
 0x3cf   :  { %v903_v62 = vmax.f32 %v898_v60, 0.0 }
 0x3d1   :  { %907 = vst [vmem:[#allocation5 + $0x40] sm:$0xff] %v903_v62 }
 0x3e0   :  { %v1067_v63 = vpop.f32.mrb[18].mxu0 }
 0x3e1   :  { %v2463_v2 = vadd.f32 %v2781_v32, %v1067_v63  ;;  %v2168_v3 = vpop.f32.mrb[19].mxu0 }
 0x3e3   :  { %2533 = vtanh.f32 %v2463_v2 }
 0x3e4   :  { %v1072_v4 = vpop.f32.mrb[20].mxu0 }
 0x3e5   :  { %v2464_v6 = vadd.f32 %v2781_v32, %v1072_v4  ;;  %v2171_v8 = vpop.f32.mrb[21].mxu0 }
 0x3e7   :  { %2535 = vtanh.f32 %v2464_v6 }
 0x3e8   :  { %v1077_v9 = vpop.f32.mrb[22].mxu0 }
 0x3e9   :  { %v2465_v11 = vadd.f32 %v2781_v32, %v1077_v9  ;;  %v2174_v12 = vpop.f32.mrb[23].mxu0 }
 0x3eb   :  { %2537 = vtanh.f32 %v2465_v11 }
 0x3ed   :  { %v2534_v14 = vpop.eup %2533 }
 0x3ee   :  { %2184 = vmatmul.mubr.msk.f32.vlgmr.msra.gmra.mrb[18].mxu1 %vm167_vm2, %v2534_v14 }
 0x3ef   :  { %2408 = vmatpush3.bf16.msra.mxu1 %v2676_v5  ;;  %2186 = vmatprep.mubr.msk.f32.mxu1 %vm2603_vm0, %v2604_v1 }
 0x3f0   :  { %2409 = vmatprep.subr.bf16.mxu1 %v2602_v0 }
 0x3f1   :  { %v2536_v15 = vpop.eup %2535 }
 0x3f2   :  { %2187 = vmatmul.mubr.msk.f32.gmra.mrb[20].mxu1 %vm167_vm2, %v2536_v15 }
 0x3f3   :  { %2411 = vmatpush3.bf16.msra.mxu1 %v2682_v7  ;;  %2189 = vmatprep.mubr.msk.f32.mxu1 %vm2603_vm0, %v2604_v1 }
 0x3f4   :  { %2412 = vmatprep.subr.bf16.mxu1 %v2602_v0 }
 0x3f5   :  { %v2538_v16 = vpop.eup %2537 }
 0x3f6   :  { %2190 = vmatmul.mubr.msk.f32.gmra.mrb[22].mxu1 %vm167_vm2, %v2538_v16 }
 0x3f7   :  { %2414 = vmatpush3.bf16.msra.mxu1 %v2692_v10  ;;  %2208 = vmatprep.mubr.msk.f32.mxu1 %vm2603_vm0, %v2604_v1 }
 0x3f8   :  { %2415 = vmatprep.subr.bf16.mxu1 %v2602_v0 }
 0x3fb   :  { %2417 = vmatpush3.bf16.msra.mxu1 %v2702_v13 }
 0x3fc   :  { %2418 = vmatprep.subr.bf16.mxu1 %v2602_v0 }
 0x3fe   :  { %2209 = vmatmul.mubr.msk.f32.vlgmr.msra.gmra.mrb[24].mxu1 %vm77_vm1, %v1184_v18 }
 0x3ff   :  { %2420 = vmatpush3.bf16.msra.mxu1 %v2712_v17  ;;  %2211 = vmatprep.mubr.msk.f32.mxu1 %vm2603_vm0, %v2604_v1 }
 0x400   :  { %2421 = vmatprep.subr.bf16.mxu1 %v2602_v0 }
 0x402   :  { %2212 = vmatmul.mubr.msk.f32.gmra.mrb[26].mxu1 %vm77_vm1, %v1185_v19 }
 0x403   :  { %2214 = vmatprep.mubr.msk.f32.mxu1 %vm2603_vm0, %v2604_v1  ;;  %2423 = vmatpush3.bf16.msra.mxu1 %v2725_v21 }
 0x404   :  { %2448 = vmatprep.subr.bf16.mxu1 %v2602_v0 }
 0x406   :  { %2215 = vmatmul.mubr.msk.f32.gmra.mrb[28].mxu1 %vm77_vm1, %v1186_v20 }
 0x407   :  { %2225 = vmatprep.mubr.msk.f32.mxu1 %vm2603_vm0, %v2604_v1 }
 0x40a   :  { %2226 = vmatmul.mubr.msk.f32.vlgmr.msra.gmra.mrb[24].mxu1 %vm167_vm2, %v2534_v14 }
 0x40b   :  { %2228 = vmatprep.mubr.msk.f32.mxu1 %vm2603_vm0, %v2604_v1  ;;  %2450 = vmatpush3.bf16.msra.mxu1 %v2760_v28 }
 0x40c   :  { %2451 = vmatprep.subr.bf16.mxu1 %v2602_v0 }
 0x40e   :  { %2229 = vmatmul.mubr.msk.f32.gmra.mrb[26].mxu1 %vm167_vm2, %v2536_v15 }
 0x40f   :  { %2231 = vmatprep.mubr.msk.f32.mxu1 %vm2603_vm0, %v2604_v1  ;;  %2453 = vmatpush3.bf16.msra.mxu1 %v2772_v31 }
 0x412   :  { %2232 = vmatmul.mubr.msk.f32.gmra.mrb[28].mxu1 %vm167_vm2, %v2538_v16 }
 0x413   :  { %2301 = vmatprep.mubr.msk.f32.mxu1 %vm2603_vm0, %v2604_v1 }
 0x4c1   :  { %v1162_v22 = vpop.f32.mrb[18].mxu1 }
 0x4c2   :  { %v1163_v23 = vadd.f32 %v2849_v51, %v1162_v22  ;;  %v2185_v24 = vpop.f32.mrb[19].mxu1 }
 0x4c4   :  { %v1176_v25 = vmax.f32 %v1163_v23, 0.0 }
 0x4c5   :  { %v1167_v28 = vpop.f32.mrb[20].mxu1 }
 0x4c6   :  { %1180 = vst [vmem:[#allocation5 + $0x48] sm:$0xff] %v1176_v25  ;;  %v1168_v26 = vadd.f32 %v2849_v51, %v1167_v28  ;;  %v2188_v27 = vpop.f32.mrb[21].mxu1 }
 0x4c8   :  { %v1177_v29 = vmax.f32 %v1168_v26, 0.0 }
 0x4c9   :  { %v1172_v30 = vpop.f32.mrb[22].mxu1 }
 0x4ca   :  { %1181 = vst [vmem:[#allocation5 + $0x50] sm:$0xff] %v1177_v29  ;;  %v1173_v31 = vadd.f32 %v2849_v51, %v1172_v30  ;;  %v2191_v33 = vpop.f32.mrb[23].mxu1 }
 0x4cc   :  { %v1178_v34 = vmax.f32 %v1173_v31, 0.0 }
 0x4ce   :  { %1182 = vst [vmem:[#allocation5 + $0x58] sm:$0xff] %v1178_v34 }
 0x4dd   :  { %v1342_v35 = vpop.f32.mrb[24].mxu1 }
 0x4de   :  { %v2466_v36 = vadd.f32 %v2781_v32, %v1342_v35  ;;  %v2227_v37 = vpop.f32.mrb[25].mxu1 }
 0x4e0   :  { %2539 = vtanh.f32 %v2466_v36 }
 0x4e1   :  { %v1347_v38 = vpop.f32.mrb[26].mxu1 }
 0x4e2   :  { %v2467_v39 = vadd.f32 %v2781_v32, %v1347_v38  ;;  %v2230_v40 = vpop.f32.mrb[27].mxu1 }
 0x4e4   :  { %2541 = vtanh.f32 %v2467_v39 }
 0x4e5   :  { %v1352_v41 = vpop.f32.mrb[28].mxu1 }
 0x4e6   :  { %v2468_v42 = vadd.f32 %v2781_v32, %v1352_v41  ;;  %v2233_v43 = vpop.f32.mrb[29].mxu1 }
 0x4e8   :  { %2543 = vtanh.f32 %v2468_v42 }
 0x4ea   :  { %v2540_v44 = vpop.eup %2539 }
 0x4eb   :  { %2243 = vmatmul.mubr.msk.f32.vlgmr.msra.gmra.mrb[24].mxu0 %vm167_vm2, %v2540_v44 }
 0x4ec   :  { %2432 = vmatpush3.bf16.msra.mxu0 %v2676_v5  ;;  %2245 = vmatprep.mubr.msk.f32.mxu0 %vm2603_vm0, %v2604_v1  ;;  %v1459_v5 = vld [vmem:[#allocation2 + $0x78] sm:$0xff] }
 0x4ed   :  { %2433 = vmatprep.subr.bf16.mxu0 %v2602_v0 }
 0x4ee   :  { %v2542_v45 = vpop.eup %2541 }
 0x4ef   :  { %2246 = vmatmul.mubr.msk.f32.gmra.mrb[26].mxu0 %vm167_vm2, %v2542_v45 }
 0x4f0   :  { %2435 = vmatpush3.bf16.msra.mxu0 %v2682_v7  ;;  %2248 = vmatprep.mubr.msk.f32.mxu0 %vm2603_vm0, %v2604_v1  ;;  %v1460_v7 = vld [vmem:[#allocation2 + $0x80] sm:$0xff] }
 0x4f1   :  { %2436 = vmatprep.subr.bf16.mxu0 %v2602_v0 }
 0x4f2   :  { %v2544_v46 = vpop.eup %2543 }
 0x4f3   :  { %2249 = vmatmul.mubr.msk.f32.gmra.mrb[28].mxu0 %vm167_vm2, %v2544_v46 }
 0x4f4   :  { %2438 = vmatpush3.bf16.msra.mxu0 %v2692_v10  ;;  %2267 = vmatprep.mubr.msk.f32.mxu0 %vm2603_vm0, %v2604_v1  ;;  %v1461_v10 = vld [vmem:[#allocation2 + $0x88] sm:$0xff] }
 0x4f5   :  { %2439 = vmatprep.subr.bf16.mxu0 %v2602_v0 }
 0x4f8   :  { %2441 = vmatpush3.bf16.msra.mxu0 %v2702_v13 }
 0x4f9   :  { %2442 = vmatprep.subr.bf16.mxu0 %v2602_v0 }
 0x4fb   :  { %2268 = vmatmul.mubr.msk.f32.vlgmr.msra.gmra.mrb[30].mxu0 %vm77_vm1, %v1459_v5 }
 0x4fc   :  { %2444 = vmatpush3.bf16.msra.mxu0 %v2712_v17  ;;  %2270 = vmatprep.mubr.msk.f32.mxu0 %vm2603_vm0, %v2604_v1 }
 0x4fd   :  { %2445 = vmatprep.subr.bf16.mxu0 %v2602_v0 }
 0x4ff   :  { %2271 = vmatmul.mubr.msk.f32.gmra.mrb[32].mxu0 %vm77_vm1, %v1460_v7 }
 0x500   :  { %2273 = vmatprep.mubr.msk.f32.mxu0 %vm2603_vm0, %v2604_v1  ;;  %2447 = vmatpush3.bf16.msra.mxu0 %v2725_v21 }
 0x503   :  { %2274 = vmatmul.mubr.msk.f32.gmra.mrb[34].mxu0 %vm77_vm1, %v1461_v10 }
 0x504   :  { %2284 = vmatprep.mubr.msk.f32.mxu0 %vm2603_vm0, %v2604_v1 }
 0x507   :  { %2285 = vmatmul.mubr.msk.f32.vlgmr.msra.gmra.mrb[30].mxu0 %vm167_vm2, %v2540_v44 }
 0x508   :  { %2287 = vmatprep.mubr.msk.f32.mxu0 %vm2603_vm0, %v2604_v1 }
 0x50b   :  { %2288 = vmatmul.mubr.msk.f32.gmra.mrb[32].mxu0 %vm167_vm2, %v2542_v45 }
 0x50c   :  { %2290 = vmatprep.mubr.msk.f32.mxu0 %vm2603_vm0, %v2604_v1 }
 0x50f   :  { %2291 = vmatmul.mubr.msk.f32.gmra.mrb[34].mxu0 %vm167_vm2, %v2544_v46 }
 0x5be   :  { %v1437_v0 = vpop.f32.mrb[24].mxu0 }
 0x5bf   :  { %v1438_v13 = vadd.f32 %v2849_v51, %v1437_v0  ;;  %v2244_v17 = vpop.f32.mrb[25].mxu0 }
 0x5c1   :  { %v1451_v21 = vmax.f32 %v1438_v13, 0.0 }
 0x5c2   :  { %v1442_v47 = vpop.f32.mrb[26].mxu0 }
 0x5c3   :  { %1455 = vst [vmem:[#allocation5 + $0x60] sm:$0xff] %v1451_v21  ;;  %v1443_v48 = vadd.f32 %v2849_v51, %v1442_v47  ;;  %v2247_v49 = vpop.f32.mrb[27].mxu0 }
 0x5c5   :  { %v1452_v50 = vmax.f32 %v1443_v48, 0.0 }
 0x5c6   :  { %v1447_v52 = vpop.f32.mrb[28].mxu0 }
 0x5c7   :  { %1456 = vst [vmem:[#allocation5 + $0x68] sm:$0xff] %v1452_v50  ;;  %v1448_v53 = vadd.f32 %v2849_v51, %v1447_v52  ;;  %v2250_v54 = vpop.f32.mrb[29].mxu0 }
 0x5c9   :  { %v1453_v55 = vmax.f32 %v1448_v53, 0.0 }
 0x5cb   :  { %1457 = vst [vmem:[#allocation5 + $0x70] sm:$0xff] %v1453_v55 }
 0x5da   :  { %v1617_v56 = vpop.f32.mrb[30].mxu0 }
 0x5db   :  { %v2469_v57 = vadd.f32 %v2781_v32, %v1617_v56  ;;  %v2286_v58 = vpop.f32.mrb[31].mxu0 }
 0x5dd   :  { %2545 = vtanh.f32 %v2469_v57 }
 0x5de   :  { %v1622_v59 = vpop.f32.mrb[32].mxu0 }
 0x5df   :  { %v2470_v60 = vadd.f32 %v2781_v32, %v1622_v59  ;;  %v2289_v61 = vpop.f32.mrb[33].mxu0 }
 0x5e1   :  { %2547 = vtanh.f32 %v2470_v60 }
 0x5e2   :  { %v1627_v62 = vpop.f32.mrb[34].mxu0 }
 0x5e3   :  { %v2471_v63 = vadd.f32 %v2781_v32, %v1627_v62  ;;  %v2292_v2 = vpop.f32.mrb[35].mxu0 }
 0x5e5   :  { %2549 = vtanh.f32 %v2471_v63 }
 0x5e7   :  { %v2546_v3 = vpop.eup %2545 }
 0x5e8   :  { %2302 = vmatmul.mubr.msk.f32.vlgmr.msra.gmra.mrb[30].mxu1 %vm167_vm2, %v2546_v3 }
 0x5e9   :  { %2304 = vmatprep.mubr.msk.f32.mxu1 %vm2603_vm0, %v2604_v1 }
 0x5eb   :  { %v2548_v4 = vpop.eup %2547 }
 0x5ec   :  { %2305 = vmatmul.mubr.msk.f32.gmra.mrb[32].mxu1 %vm167_vm2, %v2548_v4 }
 0x5ed   :  { %2307 = vmatprep.mubr.msk.f32.mxu1 %vm2603_vm0, %v2604_v1 }
 0x5ef   :  { %v2550_v6 = vpop.eup %2549 }
 0x5f0   :  { %2308 = vmatmul.mubr.msk.f32.gmra.mrb[34].mxu1 %vm167_vm2, %v2550_v6 }
 0x6bb   :  { %v1712_v8 = vpop.f32.mrb[30].mxu1 }
 0x6bc   :  { %v1713_v32 = vadd.f32 %v2849_v51, %v1712_v8  ;;  %v2303_v9 = vpop.f32.mrb[31].mxu1 }
 0x6be   :  { %v1726_v11 = vmax.f32 %v1713_v32, 0.0 }
 0x6bf   :  { %v1717_v12 = vpop.f32.mrb[32].mxu1 }
 0x6c0   :  { %1730 = vst [vmem:[#allocation5 + $0x78] sm:$0xff] %v1726_v11  ;;  %v1718_v14 = vadd.f32 %v2849_v51, %v1717_v12  ;;  %v2306_v15 = vpop.f32.mrb[33].mxu1 }
 0x6c2   :  { %v1727_v16 = vmax.f32 %v1718_v14, 0.0 }
 0x6c3   :  { %v1722_v18 = vpop.f32.mrb[34].mxu1 }
 0x6c4   :  { %1731 = vst [vmem:[#allocation5 + $0x80] sm:$0xff] %v1727_v16  ;;  %v1723_v1 = vadd.f32 %v2849_v51, %v1722_v18  ;;  %v2309_v19 = vpop.f32.mrb[35].mxu1 }
 0x6c6   :  { %v1728_v20 = vmax.f32 %v1723_v1, 0.0 }
 0x6c8   :  { %1732 = vst [vmem:[#allocation5 + $0x88] sm:$0xff] %v1728_v20 }
 0x6c9   :  { %2584 = shalt.err (!%p2581_p12)
}
 0x6ca   :  { %s2585_s10 = scalar_lea.hbm %s3060_s7, 2304 }
 0x6cb   :  { %p2586_p13 = scmp.ne.s32.totalorder %s3060_s7, %s2585_s10  ;;  %p2589_p0 = scmp.lt.u32.totalorder %s2585_s10, %s3060_s7 }
 0x6cd   :  { %p2591_p1 = pnand %p2589_p0, %p2586_p13 }
 0x6cf   :  { %2594 = shalt.err (!%p2591_p1)
}
 0x6d0   :  { %1744 = dma.vmem_to_hbm [thread:$0]  %s1739_s29, 2304, %s3060_s7, [#allocation4], %s2600_s11, %s2600_s11, %s2601_s12  }
 0x6d1   :  { %2597 = dma.done.wait [#allocation4], 2304  }
 0x6d2   :  { %2598 = vsyncadd [#allocation4], 4294964992 }
 0x6d3   :  { %1748 = vsyncpa [#allocation3], 1 }
 0x6d4   :  { %1749 = vsyncpa [#allocation4], 1 }

</bundles_post_ra>
